<compile_context>
chip_gen: v7x
topology: tpu7x:2x2x1
jax: 0.10.0
libtpu: 0.0.40
codegen_flags: <defaults>
</compile_context>

<pallas_src>
import jax
import jax.numpy as jnp
from jax.experimental import pallas as pl
from jax.experimental.pallas import tpu as pltpu


def _round_up(x, m):
    return ((x + m - 1) // m) * m


def critic_kernel(obs_ref, w1_ref, b1_ref, w2_ref, b2_ref, w3_ref, b3_ref, out_ref):
    # Cast obs to the matmul compute dtype inside the kernel (VPU, ~free).
    x = obs_ref[...].astype(w1_ref.dtype)
    # hidden layer 1: tanh(obs @ W1 + b1)   (MXU matmul, f32 accumulation)
    h = jnp.dot(x, w1_ref[...], preferred_element_type=jnp.float32)
    h = jnp.tanh(h + b1_ref[...])                       # f32 tanh on the EUP
    # hidden layer 2: tanh(h @ W2 + b2)
    h = jnp.dot(h.astype(w2_ref.dtype), w2_ref[...],
                preferred_element_type=jnp.float32)
    h = jnp.tanh(h + b2_ref[...])
    # output layer (hidden -> 1, identity): plain (tb, h2) @ (h2, 1) -> (tb, 1);
    # no transpose, no weight streaming.  b3 is a scalar from SMEM.
    v = jnp.dot(h, w3_ref[...], preferred_element_type=jnp.float32)
    out_ref[...] = v + b3_ref[0, 0]


def critic_forward(obs, params, *, block_b=8192, compute_dtype=jnp.bfloat16):
    """obs: (B, obs_dim) -> (B,) float32 value estimates."""
    w1, b1, w2, b2, w3, b3 = params
    B, obs_dim = obs.shape
    h1 = w1.shape[1]
    h2 = w2.shape[1]

    # Only the tiny, VMEM-resident hidden-layer weights are cast in the
    # wrapper; obs stays in its HBM dtype and is cast in-kernel.
    w1_c = w1.astype(compute_dtype)
    w2_c = w2.astype(compute_dtype)
    b1_c = b1.astype(jnp.float32)
    b2_c = b2.astype(jnp.float32)
    w3_c = jnp.reshape(w3, (h2, 1)).astype(jnp.float32)
    b3_c = jnp.reshape(b3, (1, 1)).astype(jnp.float32)   # scalar, lives in SMEM

    # Batch tiling: sublane-aligned (multiple of 8).  If one tile would cover
    # a large batch, split into two so the "parallel" grid axis can feed both
    # TensorCores on v7x.
    tb = min(block_b, _round_up(B, 8))
    if tb >= B and B > 2048:
        tb = _round_up((B + 1) // 2, 8)
    tb = max(tb, 8)
    grid = (pl.cdiv(B, tb),)   # partial last block handled by Pallas, no pad

    f32b = 4
    c_itemsize = jnp.dtype(compute_dtype).itemsize
    cost = pl.CostEstimate(
        flops=2 * B * (obs_dim * h1 + h1 * h2 + h2),
        transcendentals=B * (h1 + h2),
        bytes_accessed=B * obs_dim * obs.dtype.itemsize
        + (obs_dim * h1 + h1 * h2) * c_itemsize
        + (h1 + h2 + h2 + 1) * f32b
        + B * f32b,
    )

    out = pl.pallas_call(
        critic_kernel,
        out_shape=jax.ShapeDtypeStruct((B, 1), jnp.float32),
        grid=grid,
        in_specs=[
            pl.BlockSpec((tb, obs_dim), lambda i: (i, 0)),   # obs tile (pipelined)
            pl.BlockSpec((obs_dim, h1), lambda i: (0, 0)),   # W1 (VMEM-resident)
            pl.BlockSpec((1, h1), lambda i: (0, 0)),         # b1
            pl.BlockSpec((h1, h2), lambda i: (0, 0)),        # W2
            pl.BlockSpec((1, h2), lambda i: (0, 0)),         # b2
            pl.BlockSpec((h2, 1), lambda i: (0, 0)),         # W3 column
            pl.BlockSpec(memory_space=pltpu.SMEM),           # b3 scalar
        ],
        out_specs=pl.BlockSpec((tb, 1), lambda i: (i, 0)),
        compiler_params=pltpu.CompilerParams(
            dimension_semantics=("parallel",),
            vmem_limit_bytes=32 * 1024 * 1024),
        cost_estimate=cost,
    )(obs, w1_c, b1_c, w2_c, b2_c, w3_c, b3_c)

    # torch.squeeze(v_net(obs), -1)
    return out[:, 0]


def init_params(key, obs_dim, hidden_sizes):
    """Deterministic synthetic init of the MLP [obs_dim, *hidden_sizes, 1]."""
    sizes = [obs_dim] + list(hidden_sizes) + [1]
    params = []
    for fan_in, fan_out in zip(sizes[:-1], sizes[1:]):
        key, kw, kb = jax.random.split(key, 3)
        scale = 1.0 / jnp.sqrt(jnp.float32(fan_in))
        w = jax.random.uniform(kw, (fan_in, fan_out), jnp.float32, -scale, scale)
        b = jax.random.uniform(kb, (1, fan_out), jnp.float32, -scale, scale)
        params += [w, b]
    return tuple(params)


def critic_ref(obs, params):
    """Pure-JAX reference for correctness checking."""
    w1, b1, w2, b2, w3, b3 = params
    h = jnp.tanh(obs @ w1 + b1)
    h = jnp.tanh(h @ w2 + b2)
    v = h @ w3 + b3
    return jnp.squeeze(v, axis=-1)


if __name__ == "__main__":
    obs_dim = 32
    hidden_sizes = (64, 64)   # activation = tanh
    batch = 8

    key = jax.random.PRNGKey(0)
    key_obs, key_obs2, key_params = jax.random.split(key, 3)

    params = init_params(key_params, obs_dim, hidden_sizes)

    # 1) small batch, single tile, f32 compute (exact path)
    obs = jax.random.normal(key_obs, (batch, obs_dim), dtype=jnp.float32)
    v_ref = critic_ref(obs, params)
    v_f32 = jax.block_until_ready(
        critic_forward(obs, params, compute_dtype=jnp.float32))
    assert v_f32.shape == (batch,)
    assert jnp.allclose(v_f32, v_ref, atol=1e-5, rtol=1e-5)

    # 2) default path: bf16 matmul inputs, f32 accumulation / tanh
    v_bf16 = jax.block_until_ready(critic_forward(obs, params))
    assert v_bf16.shape == (batch,)
    assert jnp.allclose(v_bf16, v_ref, atol=5e-2, rtol=5e-2)

    # 3) multi-tile ragged batch: partial last block, no wrapper-side pad
    big_batch = 300
    obs_big = jax.random.normal(key_obs2, (big_batch, obs_dim), dtype=jnp.float32)
    v_big = jax.block_until_ready(
        critic_forward(obs_big, params, block_b=128, compute_dtype=jnp.float32))
    v_big_ref = critic_ref(obs_big, params)
    assert v_big.shape == (big_batch,)
    assert jnp.allclose(v_big, v_big_ref, atol=1e-5, rtol=1e-5)

    print("KERNEL_OK")
</pallas_src>

<mosaic_0001>
module attributes {stable_mosaic.version = 11 : i64} {
  func.func @critic_kernel(%arg0: i32, %arg1: memref<8x32xf32, #tpu.memory_space<vmem>>, %arg2: memref<32x64xf32, #tpu.memory_space<vmem>>, %arg3: memref<1x64xf32, #tpu.memory_space<vmem>>, %arg4: memref<64x64xf32, #tpu.memory_space<vmem>>, %arg5: memref<1x64xf32, #tpu.memory_space<vmem>>, %arg6: memref<64x1xf32, #tpu.memory_space<vmem>>, %arg7: memref<1x1xf32, #tpu.memory_space<smem>>, %arg8: memref<8x1xf32, #tpu.memory_space<vmem>>) attributes {dimension_semantics = [#tpu.dimension_semantics<parallel>], iteration_bounds = array<i64: 1>, scalar_prefetch = 0 : i64, scratch_operands = 0 : i64, tpu.core_type = #tpu.core_type<tc>, window_params = [{transform_indices = @transform_0, window_bounds = array<i64: 8, 32>}, {pipeline_mode = #tpu.pipeline_mode<synchronous>, transform_indices = @transform_1, window_bounds = array<i64: 32, 64>}, {pipeline_mode = #tpu.pipeline_mode<synchronous>, transform_indices = @transform_2, window_bounds = array<i64: 1, 64>}, {pipeline_mode = #tpu.pipeline_mode<synchronous>, transform_indices = @transform_3, window_bounds = array<i64: 64, 64>}, {pipeline_mode = #tpu.pipeline_mode<synchronous>, transform_indices = @transform_4, window_bounds = array<i64: 1, 64>}, {pipeline_mode = #tpu.pipeline_mode<synchronous>, transform_indices = @transform_5, window_bounds = array<i64: 64, 1>}, {transform_indices = @transform_6, window_bounds = array<i64: 1, 1>}, {transform_indices = @transform_7, window_bounds = array<i64: 8, 1>}]} {
    %c0 = arith.constant 0 : index
    %c0_0 = arith.constant 0 : index
    %0 = vector.load %arg1[%c0, %c0_0] : memref<8x32xf32, #tpu.memory_space<vmem>>, vector<8x32xf32>
    %c0_1 = arith.constant 0 : index
    %c0_2 = arith.constant 0 : index
    %1 = vector.load %arg2[%c0_1, %c0_2] : memref<32x64xf32, #tpu.memory_space<vmem>>, vector<32x64xf32>
    %cst = arith.constant dense<0.000000e+00> : vector<8x64xf32>
    %2 = tpu.matmul %0, %1, %cst {dimension_numbers = #tpu.dot_dimension_numbers<[1], [0], [0], [1], [0, 0, 1, 1], [], []>} : vector<8x32xf32>, vector<32x64xf32>, vector<8x64xf32> -> vector<8x64xf32>
    %c0_3 = arith.constant 0 : index
    %c0_4 = arith.constant 0 : index
    %3 = vector.load %arg3[%c0_3, %c0_4] : memref<1x64xf32, #tpu.memory_space<vmem>>, vector<1x64xf32>
    %4 = vector.broadcast %3 : vector<1x64xf32> to vector<8x64xf32>
    %5 = arith.addf %2, %4 : vector<8x64xf32>
    %6 = math.tanh %5 : vector<8x64xf32>
    %c0_5 = arith.constant 0 : index
    %c0_6 = arith.constant 0 : index
    %7 = vector.load %arg4[%c0_5, %c0_6] : memref<64x64xf32, #tpu.memory_space<vmem>>, vector<64x64xf32>
    %cst_7 = arith.constant dense<0.000000e+00> : vector<8x64xf32>
    %8 = tpu.matmul %6, %7, %cst_7 {dimension_numbers = #tpu.dot_dimension_numbers<[1], [0], [0], [1], [0, 0, 1, 1], [], []>} : vector<8x64xf32>, vector<64x64xf32>, vector<8x64xf32> -> vector<8x64xf32>
    %c0_8 = arith.constant 0 : index
    %c0_9 = arith.constant 0 : index
    %9 = vector.load %arg5[%c0_8, %c0_9] : memref<1x64xf32, #tpu.memory_space<vmem>>, vector<1x64xf32>
    %10 = vector.broadcast %9 : vector<1x64xf32> to vector<8x64xf32>
    %11 = arith.addf %8, %10 : vector<8x64xf32>
    %12 = math.tanh %11 : vector<8x64xf32>
    %c0_10 = arith.constant 0 : index
    %c0_11 = arith.constant 0 : index
    %13 = vector.load %arg6[%c0_10, %c0_11] : memref<64x1xf32, #tpu.memory_space<vmem>>, vector<64x1xf32>
    %cst_12 = arith.constant dense<0.000000e+00> : vector<8x1xf32>
    %14 = tpu.matmul %12, %13, %cst_12 {dimension_numbers = #tpu.dot_dimension_numbers<[1], [0], [0], [1], [0, 0, 1, 1], [], []>} : vector<8x64xf32>, vector<64x1xf32>, vector<8x1xf32> -> vector<8x1xf32>
    %c0_13 = arith.constant 0 : index
    %c0_14 = arith.constant 0 : index
    %15 = memref.load %arg7[%c0_13, %c0_14] : memref<1x1xf32, #tpu.memory_space<smem>>
    %16 = vector.broadcast %15 : f32 to vector<8x1xf32>
    %17 = arith.addf %14, %16 : vector<8x1xf32>
    %c0_15 = arith.constant 0 : index
    %c0_16 = arith.constant 0 : index
    %18 = vector.load %arg8[%c0_15, %c0_16] : memref<8x1xf32, #tpu.memory_space<vmem>>, vector<8x1xf32>
    tpu.vector_store %arg8[%c0_15, %c0_16], %17 {strides = array<i32>} : memref<8x1xf32, #tpu.memory_space<vmem>>, vector<8x1xf32>,
    return
  }
  func.func @transform_0(%arg0: i32) -> (i32, i32) {
    %c0_i32 = arith.constant 0 : i32
    %c0_i32_0 = arith.constant 0 : i32
    return %arg0, %c0_i32 : i32, i32
  }
  func.func @transform_1(%arg0: i32) -> (i32, i32) {
    %c0_i32 = arith.constant 0 : i32
    %c0_i32_0 = arith.constant 0 : i32
    %c0_i32_1 = arith.constant 0 : i32
    return %c0_i32, %c0_i32_0 : i32, i32
  }
  func.func @transform_2(%arg0: i32) -> (i32, i32) {
    %c0_i32 = arith.constant 0 : i32
    %c0_i32_0 = arith.constant 0 : i32
    %c0_i32_1 = arith.constant 0 : i32
    return %c0_i32, %c0_i32_0 : i32, i32
  }
  func.func @transform_3(%arg0: i32) -> (i32, i32) {
    %c0_i32 = arith.constant 0 : i32
    %c0_i32_0 = arith.constant 0 : i32
    %c0_i32_1 = arith.constant 0 : i32
    return %c0_i32, %c0_i32_0 : i32, i32
  }
  func.func @transform_4(%arg0: i32) -> (i32, i32) {
    %c0_i32 = arith.constant 0 : i32
    %c0_i32_0 = arith.constant 0 : i32
    %c0_i32_1 = arith.constant 0 : i32
    return %c0_i32, %c0_i32_0 : i32, i32
  }
  func.func @transform_5(%arg0: i32) -> (i32, i32) {
    %c0_i32 = arith.constant 0 : i32
    %c0_i32_0 = arith.constant 0 : i32
    %c0_i32_1 = arith.constant 0 : i32
    return %c0_i32, %c0_i32_0 : i32, i32
  }
  func.func @transform_6(%arg0: i32) -> (i32, i32) {
    %c0_i32 = arith.constant 0 : i32
    %c0_i32_0 = arith.constant 0 : i32
    %c0_i32_1 = arith.constant 0 : i32
    return %c0_i32, %c0_i32_0 : i32, i32
  }
  func.func @transform_7(%arg0: i32) -> (i32, i32) {
    %c0_i32 = arith.constant 0 : i32
    %c0_i32_0 = arith.constant 0 : i32
    return %arg0, %c0_i32 : i32, i32
  }
}

</mosaic_0001>

<bundles_post_ra>
// kernel: tpu_custom_call.1
= control target key start
LH: loop header
LB: loop body
LE: loop exit
PB: predicated region body
PF: predicated region fallthrough
CT: control target
= control target key end

     0   :  { %13 = vsyncpa [#allocation4], 0  ;;  %s449_s24 = smov [#allocation3]   ;;  %s585_s0 = inlined_call_operand.vmem [shape: f32[8,32], index: 0, kind: input, shape index: {}]   ;;  %s586_s1 = inlined_call_operand.hbm [shape: f32[32,64], index: 1, kind: input, shape index: {}]   ;;  %s587_s2 = inlined_call_operand.vmem [shape: f32[1,64], index: 2, kind: input, shape index: {}]   ;;  %s588_s3 = inlined_call_operand.vmem [shape: f32[64,64], index: 3, kind: input, shape index: {}]   ;;  %s589_s4 = inlined_call_operand.vmem [shape: f32[1,64], index: 4, kind: input, shape index: {}]   ;;  %s590_s5 = inlined_call_operand.vmem [shape: f32[64,1], index: 5, kind: input, shape index: {}]   ;;  %s591_s6 = inlined_call_operand.<no memory space> [shape: f32[1,1], index: 6, kind: input, shape index: {}]   ;;  %s592_s7 = inlined_call_operand.vmem [shape: f32[8,1], index: 7, kind: output, shape index: {}]  }
   0x1   :  { %s21_s25 = sshll.u32 %s449_s24, 4  ;;  %s425_s28 = scalar_lea.hbm %s586_s1, 512  ;;  %s22_s25 = int_to_ptr.vmem [resolvable:$true] %s21_s25 }
   0x2   :  { %p426_p0 = scmp.ne.s32.totalorder %s586_s1, %s425_s28  ;;  %p429_p1 = scmp.lt.u32.totalorder %s425_s28, %s586_s1 }
   0x4   :  { %p431_p2 = pnand %p429_p1, %p426_p0 }
   0x6   :  { %434 = shalt.err (!%p431_p2)
}
   0x7   :  { %s435_s10 = scalar_lea.vmem %s22_s25, 512  ;;  %p440_p4 = scmp.lt.s32.totalorder %s22_s25, %s22_s25 }
   0x8   :  { %p436_p3 = scmp.ne.s32.totalorder %s22_s25, %s435_s10  ;;  %p441_p5 = scmp.lt.s32.totalorder %s435_s10, %s435_s10 }
   0xa   :  { %p442_p6 = por %p441_p5, %p440_p4 }
   0xc   :  { %p443_p7 = pnand %p442_p6, %p436_p3 }
   0xe   :  { %446 = shalt.err (!%p443_p7)
}
   0xf   :  { %s450_s11 = smov 128   ;;  %s451_s12 = smov 8  }
  0x10   :  { %27 = dma.hbm_to_vmem [thread:$0]  %s586_s1, 512, %s22_s25, [#allocation4], %s450_s11, %s450_s11, %s451_s12  }
  0x11   :  { %447 = dma.done.wait [#allocation4], 512  }
  0x12   :  { %448 = vsyncadd [#allocation4], 4294966784  ;;  %v452_v0 = vmov 0.0|0.0   ;;  %vm453_vm0 = vmmov 0   ;;  %v454_v1 = vmov 0.0   ;;  %v42_v2 = vld [vmem:[#allocation3] sm:$0xff]  ;;  %v227_v43 = vstv %s591_s6 }
  0x13   :  { %385 = vmatprep.subr.bf16.mxu0 %v452_v0  ;;  %344 = vmatprep.mubr.msk.f32.mxu0 %vm453_vm0, %v454_v1  ;;  %v43_v3 = vld [vmem:[#allocation3 + $0x8] sm:$0xff]  ;;  %v44_v4 = vld [vmem:[#allocation3 + $0x10] sm:$0xff]  ;;  %v45_v6 = vld [vmem:[#allocation3 + $0x18] sm:$0xff]  ;;  %vm53_vm1 = vcmask 261120   ;;  %vm143_vm2 = vcmask 523264   ;;  %vm301_vm3 = vcmask 7168  }
  0x14   :  { %391 = vmatprep.subr.bf16.mxu1 %v452_v0  ;;  %363 = vmatprep.mubr.msk.f32.mxu1 %vm453_vm0, %v454_v1  ;;  %v386_v5 = vpack.c.bf16 %v43_v3, %v42_v2  ;;  %v128_v7 = vld [vmem:[%s588_s3] sm:$0xff]  ;;  %v129_v8 = vld [vmem:[%s588_s3 + $0x8] sm:$0xff]  ;;  %v389_v9 = vpack.c.bf16 %v45_v6, %v44_v4  ;;  %v130_v12 = vld [vmem:[%s588_s3 + $0x10] sm:$0xff] }
  0x15   :  { %v392_v10 = vpack.c.bf16 %v129_v8, %v128_v7  ;;  %v41_v11 = vld [vmem:[%s585_s0] sm:$0xff]  ;;  %v131_v13 = vld [vmem:[%s588_s3 + $0x18] sm:$0xff]  ;;  %v133_v16 = vld [vmem:[%s588_s3 + $0x28] sm:$0xff] }
  0x16   :  { %387 = vmatpush3.bf16.msra.mxu0 %v386_v5  ;;  %v395_v14 = vpack.c.bf16 %v131_v13, %v130_v12  ;;  %v132_v15 = vld [vmem:[%s588_s3 + $0x20] sm:$0xff]  ;;  %v134_v18 = vld [vmem:[%s588_s3 + $0x30] sm:$0xff]  ;;  %v135_v19 = vld [vmem:[%s588_s3 + $0x38] sm:$0xff] }
  0x17   :  { %388 = vmatprep.subr.bf16.mxu0 %v452_v0  ;;  %393 = vmatpush3.bf16.msra.mxu1 %v392_v10  ;;  %v398_v17 = vpack.c.bf16 %v133_v16, %v132_v15  ;;  %v401_v20 = vpack.c.bf16 %v135_v19, %v134_v18  ;;  %v218_v21 = vld [vmem:[%s590_s5] sm:$0xff]  ;;  %v219_v22 = vld [vmem:[%s590_s5 + $0x8] sm:$0xff]  ;;  %v220_v29 = vld [vmem:[%s590_s5 + $0x10] sm:$0xff] }
  0x18   :  { %394 = vmatprep.subr.bf16.mxu1 %v452_v0  ;;  %v404_v23 = vpack.c.bf16 %v219_v22, %v218_v21  ;;  %v308_v24 = vld [vmem:[%s587_s2] ss:$0 sm:$0xff]  ;;  %v221_v30 = vld [vmem:[%s590_s5 + $0x18] sm:$0xff]  ;;  %v223_v33 = vld [vmem:[%s590_s5 + $0x28] sm:$0xff] }
  0x19   :  { %v407_v31 = vpack.c.bf16 %v221_v30, %v220_v29  ;;  %v222_v32 = vld [vmem:[%s590_s5 + $0x20] sm:$0xff]  ;;  %v224_v35 = vld [vmem:[%s590_s5 + $0x30] sm:$0xff]  ;;  %v225_v36 = vld [vmem:[%s590_s5 + $0x38] sm:$0xff] }
  0x1a   :  { %390 = vmatpush3.bf16.msra.mxu0 %v389_v9  ;;  %v410_v34 = vpack.c.bf16 %v223_v33, %v222_v32  ;;  %v413_v37 = vpack.c.bf16 %v225_v36, %v224_v35  ;;  %v310_v38 = vld [vmem:[%s589_s4] ss:$0 sm:$0xff] }
  0x1b   :  { %403 = vmatprep.subr.bf16.mxu0 %v452_v0  ;;  %396 = vmatpush3.bf16.msra.mxu1 %v395_v14 }
  0x1c   :  { %397 = vmatprep.subr.bf16.mxu1 %v452_v0 }
  0x1d   :  { %345 = vmatmul.mubr.msk.f32.vlgmr.msra.gmra.mrb[0].mxu0 %vm53_vm1, %v41_v11 }
  0x1e   :  { %382 = vmatprep.mubr.msk.f32.mxu0 %vm453_vm0, %v454_v1  ;;  %405 = vmatpush3.bf16.msra.mxu0 %v404_v23 }
  0x1f   :  { %399 = vmatpush3.bf16.msra.mxu1 %v398_v17  ;;  %406 = vmatprep.subr.bf16.mxu0 %v452_v0 }
  0x20   :  { %400 = vmatprep.subr.bf16.mxu1 %v452_v0 }
  0x22   :  { %408 = vmatpush3.bf16.msra.mxu0 %v407_v31 }
  0x23   :  { %402 = vmatpush3.bf16.msra.mxu1 %v401_v20  ;;  %409 = vmatprep.subr.bf16.mxu0 %v452_v0 }
  0x26   :  { %411 = vmatpush3.bf16.msra.mxu0 %v410_v34 }
  0x27   :  { %412 = vmatprep.subr.bf16.mxu0 %v452_v0 }
  0x2a   :  { %414 = vmatpush3.bf16.msra.mxu0 %v413_v37 }
  0xf0   :  { %v123_v25 = vpop.f32.mrb[0].mxu0 }
  0xf1   :  { %v124_v26 = vadd.f32 %v308_v24, %v123_v25  ;;  %v346_v27 = vpop.f32.mrb[1].mxu0 }
  0xf3   :  { %421 = vtanh.f32 %v124_v26 }
  0xfd   :  { %v422_v28 = vpop.eup %421 }
  0xfe   :  { %364 = vmatmul.mubr.msk.f32.vlgmr.msra.gmra.mrb[0].mxu1 %vm143_vm2, %v422_v28 }
 0x1d1   :  { %v213_v39 = vpop.f32.mrb[0].mxu1 }
 0x1d2   :  { %v214_v40 = vadd.f32 %v310_v38, %v213_v39  ;;  %v365_v41 = vpop.f32.mrb[1].mxu1 }
 0x1d4   :  { %423 = vtanh.f32 %v214_v40 }
 0x1de   :  { %v424_v42 = vpop.eup %423 }
 0x1df   :  { %383 = vmatmul.mubr.msk.f32.vlgmr.msra.gmra.mrb[2].mxu0 %vm143_vm2, %v424_v42 }
 0x2b2   :  { %v297_v44 = vpop.f32.mrb[2].mxu0 }
 0x2b3   :  { %v298_v45 = vadd.f32 %v297_v44, %v227_v43  ;;  %v384_v46 = vpop.f32.mrb[3].mxu0 }
 0x2b5   :  { %302 = vst.msk [vmem:[%s592_s7] sm:$0xff] %vm301_vm3, %v298_v45 }
 0x2b6   :  { %307 = vsyncpa [#allocation4], 1 }

</bundles_post_ra>
